<compile_context>
chip_gen: v7x
topology: tpu7x:2x2x1
jax: 0.10.0
libtpu: 0.0.40
codegen_flags: <defaults>
</compile_context>

<pallas_src>
import functools

import jax
import jax.numpy as jnp
import numpy as np
from jax.experimental import pallas as pl
from jax.experimental.pallas import tpu as pltpu


# ----------------------------------------------------------------------------
# Config (mirrors the PyTorch module __init__; no learned parameters exist)
# ----------------------------------------------------------------------------
SOFTMAX_TEMP = 0.01
WINDOW_SIZE = 2
SCORE_COMP = True


def get_indices(batch_size, window_size):
    """src ('keypoint') frame indices and target ('dense') frame indices."""
    kp_inds, dense_inds = [], []
    for i in range(batch_size):
        for j in range(window_size - 1):
            idx = i * window_size + j
            kp_inds.append(idx)
            dense_inds.append(idx + 1)
    return kp_inds, dense_inds


def _precise_rsqrt(x):
    """EUP rsqrt + one Newton step -> full f32 accuracy.

    Needed because 1/softmax_temp = 100 multiplies any normalization error
    inside the softmax exponent.
    """
    y = jax.lax.rsqrt(x)
    return y * (1.5 - 0.5 * x * y * y)


def _precise_reciprocal(x):
    """EUP reciprocal (approx) + one Newton step -> full f32 accuracy."""
    r = pl.reciprocal(x, approx=True)
    return r * (2.0 - x * r)


# ----------------------------------------------------------------------------
# Pallas kernel: one window-pair per grid step
# ----------------------------------------------------------------------------
def _matcher_kernel(kp_ref, dn_ref,          # scalar-prefetch tables (SMEM), unused in body
                    src_desc_ref,            # (C, N)
                    src_scores_ref,          # (N, 1)
                    tgt_desc_ref,            # (C, HW)
                    tgt_scores_ref,          # (1, HW)
                    pc_ref,                  # out: (N, 2)  columns = (u, v)
                    mw_ref,                  # out: (N, 1)
                    *, inv_temp, height, width, score_comp):
    del kp_ref, dn_ref
    C, N = src_desc_ref.shape
    _, HW = tgt_desc_ref.shape
    f32 = jnp.float32

    src = src_desc_ref[...]
    tgt = tgt_desc_ref[...]

    # F.normalize(dim=1), eps=1e-12:  x * rsqrt(max(||x||^2, eps^2)), Newton-refined.
    inv_src = _precise_rsqrt(jnp.maximum(jnp.sum(src * src, axis=0, keepdims=True), 1e-24))
    inv_tgt = _precise_rsqrt(jnp.maximum(jnp.sum(tgt * tgt, axis=0, keepdims=True), 1e-24))
    src_n = src * inv_src                                     # (C, N)

    # Raw descriptor dot products -- the ONLY MXU op in the kernel.  Kept at
    # f32 HIGHEST: the 1/temp = 100 amplification turns any relative logit
    # error into a large additive softmax-exponent error (single-pass bf16
    # would be ~0.4 there).  Production alternative: Precision.HIGH (3-pass).
    raw = jax.lax.dot_general(
        src_n, tgt, (((0,), (0,)), ((), ())),
        preferred_element_type=f32,
        precision=jax.lax.Precision.HIGHEST)                  # (N, HW)

    logits = raw * (inv_tgt * inv_temp)                       # (N, HW), (1,HW) row bcast

    # Softmax over the dense (lane) axis, kept unnormalized until the (N,1) end.
    m = jnp.max(logits, axis=1, keepdims=True)                # (N, 1)
    e = jnp.exp(logits - m)                                   # (N, HW)
    inv_denom = _precise_reciprocal(jnp.sum(e, axis=1, keepdims=True))  # (N, 1)

    # Pixel coordinates of the flattened HW axis (lane-major rows): u=col, v=row.
    flat = jax.lax.broadcasted_iota(jnp.int32, (1, HW), 1)
    if width & (width - 1) == 0:
        row_i = flat >> (width.bit_length() - 1)
        col_i = flat & (width - 1)
    else:
        # exact float floor-divide (valid for HW < 2**24)
        row_i = jnp.floor((flat.astype(f32) + 0.5) * (1.0 / width)).astype(jnp.int32)
        col_i = flat - row_i * width
    col_f = col_i.astype(f32)
    row_f = row_i.astype(f32)

    # Soft-argmax coordinates: VPU multiply + lane reduce (no MXU), full f32.
    u = jnp.sum(e * col_f, axis=1, keepdims=True) * inv_denom  # (N, 1)
    v = jnp.sum(e * row_f, axis=1, keepdims=True) * inv_denom  # (N, 1)
    pc_ref[:, 0:1] = u
    pc_ref[:, 1:2] = v

    if not score_comp:
        mw_ref[...] = src_scores_ref[...]
        return

    # normalize_coords + grid_sample(align_corners=False) source positions, fused:
    #   ix = ((2u/(W-1) - 1) + 1) * W/2 - 0.5 = u * W/(W-1) - 0.5   (same for iy / H)
    ix = u * (width / (width - 1.0)) - 0.5
    iy = v * (height / (height - 1.0)) - 0.5
    x0f = jnp.floor(ix)
    y0f = jnp.floor(iy)
    fx = ix - x0f
    fy = iy - y0f
    x0 = x0f.astype(jnp.int32)
    y0 = y0f.astype(jnp.int32)
    x1 = x0 + 1
    y1 = y0 + 1

    # Separable bilinear weights, lane-major (N, HW).  Out-of-range corners
    # (x = -1 / W, y = -1 / H) match no row/col index, reproducing grid_sample's
    # zero padding exactly.
    ry = jnp.where(row_i == y0, 1.0 - fy, jnp.where(row_i == y1, fy, 0.0))   # (N, HW)
    cx = jnp.where(col_i == x0, 1.0 - fx, jnp.where(col_i == x1, fx, 0.0))   # (N, HW)
    w_bil = ry * cx                                                          # (N, HW)

    # grid_sample folded through linearity -> no (C,HW)x(HW,N) matmul needed:
    #   grid_sample(scores)[n]              = sum_hw w_bil[n,hw] * scores[hw]
    #   <src_n[:,n], grid_sample(desc)[:,n]> = sum_hw w_bil[n,hw] * raw[n,hw]
    pseudo_scores = jnp.sum(w_bil * tgt_scores_ref[...], axis=1, keepdims=True)   # (N, 1)
    desc_match_score = jnp.sum(w_bil * raw, axis=1, keepdims=True) * (1.0 / C)    # (N, 1)

    mw_ref[...] = 0.5 * (desc_match_score + 1.0) * src_scores_ref[...] * pseudo_scores


# ----------------------------------------------------------------------------
# Wrapper: scalar-prefetch index tables, free NCHW -> (C, H*W) reshape
# ----------------------------------------------------------------------------
def softmax_matcher_forward(keypoint_scores, keypoint_desc, scores_dense, desc_dense,
                            window_size=WINDOW_SIZE, softmax_temp=SOFTMAX_TEMP,
                            score_comp=SCORE_COMP):
    BW, C, N = keypoint_desc.shape
    _, _, H, W = desc_dense.shape
    HW = H * W
    b = BW // window_size

    kp_inds, dense_inds = get_indices(b, window_size)
    kp = jnp.asarray(kp_inds, dtype=jnp.int32)
    dn = jnp.asarray(dense_inds, dtype=jnp.int32)
    B = len(kp_inds)

    # Trailing-dim collapses / size-1 axis swaps only: no data movement.
    desc_flat = desc_dense.reshape(BW, C, HW)
    scores_flat = scores_dense.reshape(BW, 1, HW)
    kp_scores_col = keypoint_scores.reshape(BW, N, 1)

    kernel = functools.partial(_matcher_kernel,
                               inv_temp=1.0 / float(softmax_temp),
                               height=H, width=W, score_comp=score_comp)

    cost = pl.CostEstimate(
        flops=int(B * (2 * C * N * HW + 14 * N * HW + 4 * C * HW + 2 * C * N)),
        transcendentals=int(B * (N * HW + HW + 2 * N)),
        bytes_accessed=int(4 * B * (C * HW + HW + C * N + N + 3 * N)),
    )

    # TODO(synk): for production-sized dense maps (HW >> 256) replace the
    # monolithic (C,HW) block with an HW-tiled online softmax + explicit
    # vmem_limit_bytes (v5e scoped default 16 MiB, v7x physical 64 MiB).
    pseudo_coords, mw_col = pl.pallas_call(
        kernel,
        out_shape=(jax.ShapeDtypeStruct((B, N, 2), jnp.float32),
                   jax.ShapeDtypeStruct((B, N, 1), jnp.float32)),
        grid_spec=pltpu.PrefetchScalarGridSpec(
            num_scalar_prefetch=2,
            grid=(B,),
            in_specs=[
                pl.BlockSpec((pl.Squeezed(), C, N), lambda i, kpr, dnr: (kpr[i], 0, 0)),
                pl.BlockSpec((pl.Squeezed(), N, 1), lambda i, kpr, dnr: (kpr[i], 0, 0)),
                pl.BlockSpec((pl.Squeezed(), C, HW), lambda i, kpr, dnr: (dnr[i], 0, 0)),
                pl.BlockSpec((pl.Squeezed(), 1, HW), lambda i, kpr, dnr: (dnr[i], 0, 0)),
            ],
            out_specs=(
                pl.BlockSpec((pl.Squeezed(), N, 2), lambda i, kpr, dnr: (i, 0, 0)),
                pl.BlockSpec((pl.Squeezed(), N, 1), lambda i, kpr, dnr: (i, 0, 0)),
            ),
        ),
        compiler_params=pltpu.CompilerParams(dimension_semantics=("parallel",)),
        cost_estimate=cost,
    )(kp, dn, keypoint_desc, kp_scores_col, desc_flat, scores_flat)

    match_weights = mw_col.reshape(B, 1, N)   # (B,N,1) -> (B,1,N): size-1 axis swap
    return pseudo_coords, match_weights, kp_inds


# ----------------------------------------------------------------------------
# Pure-JAX reference (gather-based grid_sample) for validation
# ----------------------------------------------------------------------------
def reference_forward(keypoint_scores, keypoint_desc, scores_dense, desc_dense,
                      window_size=WINDOW_SIZE, softmax_temp=SOFTMAX_TEMP,
                      score_comp=SCORE_COMP):
    hp = jax.lax.Precision.HIGHEST
    BW, C, N = keypoint_desc.shape
    _, _, H, W = desc_dense.shape
    b = BW // window_size
    kp_inds, dense_inds = get_indices(b, window_size)
    kp = jnp.asarray(kp_inds)
    dn = jnp.asarray(dense_inds)

    src_desc = keypoint_desc[kp]
    src_desc = src_desc / jnp.maximum(jnp.linalg.norm(src_desc, axis=1, keepdims=True), 1e-12)
    tgt_desc_dense = desc_dense[dn]                            # (B, C, H, W)
    tgt = tgt_desc_dense.reshape(-1, C, H * W)
    tgt_n = tgt / jnp.maximum(jnp.linalg.norm(tgt, axis=1, keepdims=True), 1e-12)

    match_vals = jnp.einsum('bcn,bcm->bnm', src_desc, tgt_n, precision=hp)
    soft = jax.nn.softmax(match_vals / softmax_temp, axis=2)   # (B, N, HW)

    vv, uu = jnp.meshgrid(jnp.arange(H), jnp.arange(W), indexing='ij')
    coords = jnp.stack([uu.reshape(-1), vv.reshape(-1)], axis=1).astype(jnp.float32)
    pseudo_coords = jnp.einsum('bnm,mt->bnt', soft, coords, precision=hp)  # (B, N, 2)

    u_norm = 2.0 * pseudo_coords[..., 0] / (W - 1.0) - 1.0
    v_norm = 2.0 * pseudo_coords[..., 1] / (H - 1.0) - 1.0
    ix = (u_norm + 1.0) * W * 0.5 - 0.5
    iy = (v_norm + 1.0) * H * 0.5 - 0.5
    x0 = jnp.floor(ix)
    y0 = jnp.floor(iy)
    fx = ix - x0
    fy = iy - y0

    def gather(img, yy, xx):
        valid = (xx >= 0) & (xx < W) & (yy >= 0) & (yy < H)
        xi = jnp.clip(xx, 0, W - 1).astype(jnp.int32)
        yi = jnp.clip(yy, 0, H - 1).astype(jnp.int32)
        vals = jax.vmap(lambda im, y_, x_: im[:, y_, x_])(img, yi, xi)  # (B, C, N)
        return vals * valid[:, None, :].astype(jnp.float32)

    def sample(img):
        return (gather(img, y0, x0) * ((1 - fy) * (1 - fx))[:, None, :]
                + gather(img, y0, x0 + 1) * ((1 - fy) * fx)[:, None, :]
                + gather(img, y0 + 1, x0) * (fy * (1 - fx))[:, None, :]
                + gather(img, y0 + 1, x0 + 1) * (fy * fx)[:, None, :])

    tgt_scores_dense = scores_dense[dn]
    pseudo_scores = sample(tgt_scores_dense)                   # (B, 1, N)
    pseudo_desc = sample(tgt_desc_dense)                       # (B, C, N)
    desc_match_score = jnp.sum(src_desc * pseudo_desc, axis=1, keepdims=True) / float(C)
    src_scores = keypoint_scores[kp]
    if score_comp:
        mw = 0.5 * (desc_match_score + 1.0) * src_scores * pseudo_scores
    else:
        mw = src_scores
    return pseudo_coords, mw, kp_inds


# ----------------------------------------------------------------------------
if __name__ == "__main__":
    b, w = 2, WINDOW_SIZE
    BW = b * w
    C, N, H, W = 32, 16, 16, 16

    key = jax.random.PRNGKey(0)
    k1, k2, k3, k4 = jax.random.split(key, 4)
    keypoint_scores = jax.random.uniform(k1, (BW, 1, N), dtype=jnp.float32)
    keypoint_desc = jax.random.normal(k2, (BW, C, N), dtype=jnp.float32)
    scores_dense = jax.random.uniform(k3, (BW, 1, H, W), dtype=jnp.float32)
    desc_dense = jax.random.normal(k4, (BW, C, H, W), dtype=jnp.float32)

    pseudo_coords, match_weights, kp_inds = softmax_matcher_forward(
        keypoint_scores, keypoint_desc, scores_dense, desc_dense)
    jax.block_until_ready((pseudo_coords, match_weights))

    ref_coords, ref_weights, ref_inds = reference_forward(
        keypoint_scores, keypoint_desc, scores_dense, desc_dense)
    jax.block_until_ready((ref_coords, ref_weights))

    assert pseudo_coords.shape == (b, N, 2)
    assert match_weights.shape == (b, 1, N)
    assert list(kp_inds) == list(ref_inds)
    np.testing.assert_allclose(np.asarray(pseudo_coords), np.asarray(ref_coords),
                               atol=5e-3, rtol=5e-3)
    np.testing.assert_allclose(np.asarray(match_weights), np.asarray(ref_weights),
                               atol=5e-3, rtol=5e-3)

    print("KERNEL_OK")
</pallas_src>

<mosaic_0001>
module attributes {stable_mosaic.version = 11 : i64} {
  func.func @_matcher_kernel(%arg0: i32, %arg1: memref<2xi32, #tpu.memory_space<smem>>, %arg2: memref<2xi32, #tpu.memory_space<smem>>, %arg3: memref<1x32x16xf32, #tpu.memory_space<vmem>>, %arg4: memref<1x16x1xf32, #tpu.memory_space<vmem>>, %arg5: memref<1x32x256xf32, #tpu.memory_space<vmem>>, %arg6: memref<1x1x256xf32, #tpu.memory_space<vmem>>, %arg7: memref<1x16x2xf32, #tpu.memory_space<vmem>>, %arg8: memref<1x16x1xf32, #tpu.memory_space<vmem>>) attributes {dimension_semantics = [#tpu.dimension_semantics<parallel>], iteration_bounds = array<i64: 2>, scalar_prefetch = 2 : i64, scratch_operands = 0 : i64, tpu.core_type = #tpu.core_type<tc>, window_params = [{transform_indices = @transform_0, window_bounds = array<i64: 1, 32, 16>}, {transform_indices = @transform_1, window_bounds = array<i64: 1, 16, 1>}, {transform_indices = @transform_2, window_bounds = array<i64: 1, 32, 256>}, {transform_indices = @transform_3, window_bounds = array<i64: 1, 1, 256>}, {transform_indices = @transform_4, window_bounds = array<i64: 1, 16, 2>}, {transform_indices = @transform_5, window_bounds = array<i64: 1, 16, 1>}]} {
    %c0 = arith.constant 0 : index
    %c0_0 = arith.constant 0 : index
    %c0_1 = arith.constant 0 : index
    %0 = vector.load %arg3[%c0, %c0_0, %c0_1] : memref<1x32x16xf32, #tpu.memory_space<vmem>>, vector<1x32x16xf32>
    %1 = vector.shape_cast %0 : vector<1x32x16xf32> to vector<32x16xf32>
    %c0_2 = arith.constant 0 : index
    %c0_3 = arith.constant 0 : index
    %c0_4 = arith.constant 0 : index
    %2 = vector.load %arg5[%c0_2, %c0_3, %c0_4] : memref<1x32x256xf32, #tpu.memory_space<vmem>>, vector<1x32x256xf32>
    %3 = vector.shape_cast %2 : vector<1x32x256xf32> to vector<32x256xf32>
    %4 = arith.mulf %1, %1 : vector<32x16xf32>
    %cst = arith.constant dense<0.000000e+00> : vector<16xf32>
    %5 = vector.multi_reduction <add>, %4, %cst [0] : vector<32x16xf32> to vector<16xf32>
    %6 = vector.shape_cast %5 : vector<16xf32> to vector<1x16xf32>
    %cst_5 = arith.constant 1.000000e-24 : f32
    %7 = vector.broadcast %cst_5 : f32 to vector<1x16xf32>
    %8 = arith.maximumf %6, %7 : vector<1x16xf32>
    %9 = math.rsqrt %8 : vector<1x16xf32>
    %cst_6 = arith.constant 5.000000e-01 : f32
    %10 = vector.broadcast %cst_6 : f32 to vector<1x16xf32>
    %11 = arith.mulf %10, %8 : vector<1x16xf32>
    %12 = arith.mulf %11, %9 : vector<1x16xf32>
    %13 = arith.mulf %12, %9 : vector<1x16xf32>
    %cst_7 = arith.constant 1.500000e+00 : f32
    %14 = vector.broadcast %cst_7 : f32 to vector<1x16xf32>
    %15 = arith.subf %14, %13 : vector<1x16xf32>
    %16 = arith.mulf %9, %15 : vector<1x16xf32>
    %17 = arith.mulf %3, %3 : vector<32x256xf32>
    %cst_8 = arith.constant dense<0.000000e+00> : vector<256xf32>
    %18 = vector.multi_reduction <add>, %17, %cst_8 [0] : vector<32x256xf32> to vector<256xf32>
    %19 = vector.shape_cast %18 : vector<256xf32> to vector<1x256xf32>
    %cst_9 = arith.constant 1.000000e-24 : f32
    %20 = vector.broadcast %cst_9 : f32 to vector<1x256xf32>
    %21 = arith.maximumf %19, %20 : vector<1x256xf32>
    %22 = math.rsqrt %21 : vector<1x256xf32>
    %cst_10 = arith.constant 5.000000e-01 : f32
    %23 = vector.broadcast %cst_10 : f32 to vector<1x256xf32>
    %24 = arith.mulf %23, %21 : vector<1x256xf32>
    %25 = arith.mulf %24, %22 : vector<1x256xf32>
    %26 = arith.mulf %25, %22 : vector<1x256xf32>
    %cst_11 = arith.constant 1.500000e+00 : f32
    %27 = vector.broadcast %cst_11 : f32 to vector<1x256xf32>
    %28 = arith.subf %27, %26 : vector<1x256xf32>
    %29 = arith.mulf %22, %28 : vector<1x256xf32>
    %30 = vector.broadcast %16 : vector<1x16xf32> to vector<32x16xf32>
    %31 = arith.mulf %1, %30 : vector<32x16xf32>
    %cst_12 = arith.constant dense<0.000000e+00> : vector<16x256xf32>
    %32 = tpu.matmul %31, %3, %cst_12 {dimension_numbers = #tpu.dot_dimension_numbers<[0], [0], [1], [1], [0, 1, 1, 1], [], []>, precision = #tpu.contract_precision<fp32>} : vector<32x16xf32>, vector<32x256xf32>, vector<16x256xf32> -> vector<16x256xf32>
    %cst_13 = arith.constant 1.000000e+02 : f32
    %33 = vector.broadcast %cst_13 : f32 to vector<1x256xf32>
    %34 = arith.mulf %29, %33 : vector<1x256xf32>
    %35 = vector.broadcast %34 : vector<1x256xf32> to vector<16x256xf32>
    %36 = arith.mulf %32, %35 : vector<16x256xf32>
    %cst_14 = arith.constant dense<0xFF800000> : vector<16xf32>
    %37 = vector.multi_reduction <maximumf>, %36, %cst_14 [1] : vector<16x256xf32> to vector<16xf32>
    %38 = vector.shape_cast %37 : vector<16xf32> to vector<16x1xf32>
    %39 = vector.broadcast %38 : vector<16x1xf32> to vector<16x256xf32>
    %40 = arith.subf %36, %39 : vector<16x256xf32>
    %41 = math.exp %40 : vector<16x256xf32>
    %cst_15 = arith.constant dense<0.000000e+00> : vector<16xf32>
    %42 = vector.multi_reduction <add>, %41, %cst_15 [1] : vector<16x256xf32> to vector<16xf32>
    %43 = vector.shape_cast %42 : vector<16xf32> to vector<16x1xf32>
    %44 = tpu.reciprocal %43 {approx = true} : vector<16x1xf32> -> vector<16x1xf32>
    %45 = arith.mulf %43, %44 : vector<16x1xf32>
    %cst_16 = arith.constant 2.000000e+00 : f32
    %46 = vector.broadcast %cst_16 : f32 to vector<16x1xf32>
    %47 = arith.subf %46, %45 : vector<16x1xf32>
    %48 = arith.mulf %44, %47 : vector<16x1xf32>
    %49 = tpu.iota {dimensions = array<i32: 1>} : vector<1x256xi32>
    %c4_i32 = arith.constant 4 : i32
    %50 = vector.broadcast %c4_i32 : i32 to vector<1x256xi32>
    %51 = arith.shrsi %49, %50 : vector<1x256xi32>
    %c15_i32 = arith.constant 15 : i32
    %52 = vector.broadcast %c15_i32 : i32 to vector<1x256xi32>
    %53 = arith.andi %49, %52 : vector<1x256xi32>
    %54 = arith.sitofp %53 : vector<1x256xi32> to vector<1x256xf32>
    %55 = arith.sitofp %51 : vector<1x256xi32> to vector<1x256xf32>
    %56 = vector.broadcast %54 : vector<1x256xf32> to vector<16x256xf32>
    %57 = arith.mulf %41, %56 : vector<16x256xf32>
    %cst_17 = arith.constant dense<0.000000e+00> : vector<16xf32>
    %58 = vector.multi_reduction <add>, %57, %cst_17 [1] : vector<16x256xf32> to vector<16xf32>
    %59 = vector.shape_cast %58 : vector<16xf32> to vector<16x1xf32>
    %60 = arith.mulf %59, %48 : vector<16x1xf32>
    %61 = vector.broadcast %55 : vector<1x256xf32> to vector<16x256xf32>
    %62 = arith.mulf %41, %61 : vector<16x256xf32>
    %cst_18 = arith.constant dense<0.000000e+00> : vector<16xf32>
    %63 = vector.multi_reduction <add>, %62, %cst_18 [1] : vector<16x256xf32> to vector<16xf32>
    %64 = vector.shape_cast %63 : vector<16xf32> to vector<16x1xf32>
    %65 = arith.mulf %64, %48 : vector<16x1xf32>
    %c0_19 = arith.constant 0 : index
    %c0_20 = arith.constant 0 : index
    %c0_21 = arith.constant 0 : index
    %66 = vector.load %arg7[%c0_19, %c0_20, %c0_21] : memref<1x16x2xf32, #tpu.memory_space<vmem>>, vector<1x16x1xf32>
    %67 = vector.shape_cast %66 : vector<1x16x1xf32> to vector<16x1xf32>
    %68 = vector.shape_cast %60 : vector<16x1xf32> to vector<1x16x1xf32>
    tpu.vector_store %arg7[%c0_19, %c0_20, %c0_21], %68 {strides = array<i32>} : memref<1x16x2xf32, #tpu.memory_space<vmem>>, vector<1x16x1xf32>,
    %c0_22 = arith.constant 0 : index
    %c0_23 = arith.constant 0 : index
    %c1 = arith.constant 1 : index
    %69 = vector.load %arg7[%c0_22, %c0_23, %c1] : memref<1x16x2xf32, #tpu.memory_space<vmem>>, vector<1x16x1xf32>
    %70 = vector.shape_cast %69 : vector<1x16x1xf32> to vector<16x1xf32>
    %71 = vector.shape_cast %65 : vector<16x1xf32> to vector<1x16x1xf32>
    tpu.vector_store %arg7[%c0_22, %c0_23, %c1], %71 {strides = array<i32>} : memref<1x16x2xf32, #tpu.memory_space<vmem>>, vector<1x16x1xf32>,
    %cst_24 = arith.constant 1.06666672 : f32
    %72 = vector.broadcast %cst_24 : f32 to vector<16x1xf32>
    %73 = arith.mulf %60, %72 : vector<16x1xf32>
    %cst_25 = arith.constant 5.000000e-01 : f32
    %74 = vector.broadcast %cst_25 : f32 to vector<16x1xf32>
    %75 = arith.subf %73, %74 : vector<16x1xf32>
    %cst_26 = arith.constant 1.06666672 : f32
    %76 = vector.broadcast %cst_26 : f32 to vector<16x1xf32>
    %77 = arith.mulf %65, %76 : vector<16x1xf32>
    %cst_27 = arith.constant 5.000000e-01 : f32
    %78 = vector.broadcast %cst_27 : f32 to vector<16x1xf32>
    %79 = arith.subf %77, %78 : vector<16x1xf32>
    %80 = math.floor %75 : vector<16x1xf32>
    %81 = math.floor %79 : vector<16x1xf32>
    %82 = arith.subf %75, %80 : vector<16x1xf32>
    %83 = arith.subf %79, %81 : vector<16x1xf32>
    %84 = arith.fptosi %80 : vector<16x1xf32> to vector<16x1xi32>
    %85 = arith.fptosi %81 : vector<16x1xf32> to vector<16x1xi32>
    %c1_i32 = arith.constant 1 : i32
    %86 = vector.broadcast %c1_i32 : i32 to vector<16x1xi32>
    %87 = arith.addi %84, %86 : vector<16x1xi32>
    %c1_i32_28 = arith.constant 1 : i32
    %88 = vector.broadcast %c1_i32_28 : i32 to vector<16x1xi32>
    %89 = arith.addi %85, %88 : vector<16x1xi32>
    %90 = vector.broadcast %51 : vector<1x256xi32> to vector<16x256xi32>
    %91 = vector.broadcast %85 : vector<16x1xi32> to vector<16x256xi32>
    %92 = arith.cmpi eq, %90, %91 : vector<16x256xi32>
    %cst_29 = arith.constant 1.000000e+00 : f32
    %93 = vector.broadcast %cst_29 : f32 to vector<16x1xf32>
    %94 = arith.subf %93, %83 : vector<16x1xf32>
    %95 = vector.broadcast %51 : vector<1x256xi32> to vector<16x256xi32>
    %96 = vector.broadcast %89 : vector<16x1xi32> to vector<16x256xi32>
    %97 = arith.cmpi eq, %95, %96 : vector<16x256xi32>
    %cst_30 = arith.constant 0.000000e+00 : f32
    %98 = vector.shape_cast %83 : vector<16x1xf32> to vector<16x1xf32>
    %99 = vector.broadcast %98 : vector<16x1xf32> to vector<16x256xf32>
    %100 = vector.broadcast %cst_30 : f32 to vector<16x256xf32>
    %101 = arith.select %97, %99, %100 : vector<16x256xi1>, vector<16x256xf32>
    %102 = vector.shape_cast %94 : vector<16x1xf32> to vector<16x1xf32>
    %103 = vector.broadcast %102 : vector<16x1xf32> to vector<16x256xf32>
    %104 = arith.select %92, %103, %101 : vector<16x256xi1>, vector<16x256xf32>
    %105 = vector.broadcast %53 : vector<1x256xi32> to vector<16x256xi32>
    %106 = vector.broadcast %84 : vector<16x1xi32> to vector<16x256xi32>
    %107 = arith.cmpi eq, %105, %106 : vector<16x256xi32>
    %cst_31 = arith.constant 1.000000e+00 : f32
    %108 = vector.broadcast %cst_31 : f32 to vector<16x1xf32>
    %109 = arith.subf %108, %82 : vector<16x1xf32>
    %110 = vector.broadcast %53 : vector<1x256xi32> to vector<16x256xi32>
    %111 = vector.broadcast %87 : vector<16x1xi32> to vector<16x256xi32>
    %112 = arith.cmpi eq, %110, %111 : vector<16x256xi32>
    %cst_32 = arith.constant 0.000000e+00 : f32
    %113 = vector.shape_cast %82 : vector<16x1xf32> to vector<16x1xf32>
    %114 = vector.broadcast %113 : vector<16x1xf32> to vector<16x256xf32>
    %115 = vector.broadcast %cst_32 : f32 to vector<16x256xf32>
    %116 = arith.select %112, %114, %115 : vector<16x256xi1>, vector<16x256xf32>
    %117 = vector.shape_cast %109 : vector<16x1xf32> to vector<16x1xf32>
    %118 = vector.broadcast %117 : vector<16x1xf32> to vector<16x256xf32>
    %119 = arith.select %107, %118, %116 : vector<16x256xi1>, vector<16x256xf32>
    %120 = arith.mulf %104, %119 : vector<16x256xf32>
    %c0_33 = arith.constant 0 : index
    %c0_34 = arith.constant 0 : index
    %c0_35 = arith.constant 0 : index
    %121 = vector.load %arg6[%c0_33, %c0_34, %c0_35] : memref<1x1x256xf32, #tpu.memory_space<vmem>>, vector<1x1x256xf32>
    %122 = vector.shape_cast %121 : vector<1x1x256xf32> to vector<1x256xf32>
    %123 = vector.broadcast %122 : vector<1x256xf32> to vector<16x256xf32>
    %124 = arith.mulf %120, %123 : vector<16x256xf32>
    %cst_36 = arith.constant dense<0.000000e+00> : vector<16xf32>
    %125 = vector.multi_reduction <add>, %124, %cst_36 [1] : vector<16x256xf32> to vector<16xf32>
    %126 = vector.shape_cast %125 : vector<16xf32> to vector<16x1xf32>
    %127 = arith.mulf %120, %32 : vector<16x256xf32>
    %cst_37 = arith.constant dense<0.000000e+00> : vector<16xf32>
    %128 = vector.multi_reduction <add>, %127, %cst_37 [1] : vector<16x256xf32> to vector<16xf32>
    %129 = vector.shape_cast %128 : vector<16xf32> to vector<16x1xf32>
    %cst_38 = arith.constant 3.125000e-02 : f32
    %130 = vector.broadcast %cst_38 : f32 to vector<16x1xf32>
    %131 = arith.mulf %129, %130 : vector<16x1xf32>
    %cst_39 = arith.constant 1.000000e+00 : f32
    %132 = vector.broadcast %cst_39 : f32 to vector<16x1xf32>
    %133 = arith.addf %131, %132 : vector<16x1xf32>
    %cst_40 = arith.constant 5.000000e-01 : f32
    %134 = vector.broadcast %cst_40 : f32 to vector<16x1xf32>
    %135 = arith.mulf %134, %133 : vector<16x1xf32>
    %c0_41 = arith.constant 0 : index
    %c0_42 = arith.constant 0 : index
    %c0_43 = arith.constant 0 : index
    %136 = vector.load %arg4[%c0_41, %c0_42, %c0_43] : memref<1x16x1xf32, #tpu.memory_space<vmem>>, vector<1x16x1xf32>
    %137 = vector.shape_cast %136 : vector<1x16x1xf32> to vector<16x1xf32>
    %138 = arith.mulf %135, %137 : vector<16x1xf32>
    %139 = arith.mulf %138, %126 : vector<16x1xf32>
    %c0_44 = arith.constant 0 : index
    %c0_45 = arith.constant 0 : index
    %c0_46 = arith.constant 0 : index
    %140 = vector.load %arg8[%c0_44, %c0_45, %c0_46] : memref<1x16x1xf32, #tpu.memory_space<vmem>>, vector<1x16x1xf32>
    %141 = vector.shape_cast %140 : vector<1x16x1xf32> to vector<16x1xf32>
    %142 = vector.shape_cast %139 : vector<16x1xf32> to vector<1x16x1xf32>
    tpu.vector_store %arg8[%c0_44, %c0_45, %c0_46], %142 {strides = array<i32>} : memref<1x16x1xf32, #tpu.memory_space<vmem>>, vector<1x16x1xf32>,
    return
  }
  func.func @transform_0(%arg0: i32, %arg1: memref<2xi32, #tpu.memory_space<smem>>, %arg2: memref<2xi32, #tpu.memory_space<smem>>) -> (i32, i32, i32) {
    %0 = arith.index_cast %arg0 : i32 to index
    %1 = memref.load %arg1[%0] : memref<2xi32, #tpu.memory_space<smem>>
    %c0_i32 = arith.constant 0 : i32
    %c0_i32_0 = arith.constant 0 : i32
    %c0_i32_1 = arith.constant 0 : i32
    return %1, %c0_i32, %c0_i32_0 : i32, i32, i32
  }
  func.func @transform_1(%arg0: i32, %arg1: memref<2xi32, #tpu.memory_space<smem>>, %arg2: memref<2xi32, #tpu.memory_space<smem>>) -> (i32, i32, i32) {
    %0 = arith.index_cast %arg0 : i32 to index
    %1 = memref.load %arg1[%0] : memref<2xi32, #tpu.memory_space<smem>>
    %c0_i32 = arith.constant 0 : i32
    %c0_i32_0 = arith.constant 0 : i32
    %c0_i32_1 = arith.constant 0 : i32
    return %1, %c0_i32, %c0_i32_0 : i32, i32, i32
  }
  func.func @transform_2(%arg0: i32, %arg1: memref<2xi32, #tpu.memory_space<smem>>, %arg2: memref<2xi32, #tpu.memory_space<smem>>) -> (i32, i32, i32) {
    %0 = arith.index_cast %arg0 : i32 to index
    %1 = memref.load %arg2[%0] : memref<2xi32, #tpu.memory_space<smem>>
    %c0_i32 = arith.constant 0 : i32
    %c0_i32_0 = arith.constant 0 : i32
    %c0_i32_1 = arith.constant 0 : i32
    return %1, %c0_i32, %c0_i32_0 : i32, i32, i32
  }
  func.func @transform_3(%arg0: i32, %arg1: memref<2xi32, #tpu.memory_space<smem>>, %arg2: memref<2xi32, #tpu.memory_space<smem>>) -> (i32, i32, i32) {
    %0 = arith.index_cast %arg0 : i32 to index
    %1 = memref.load %arg2[%0] : memref<2xi32, #tpu.memory_space<smem>>
    %c0_i32 = arith.constant 0 : i32
    %c0_i32_0 = arith.constant 0 : i32
    %c0_i32_1 = arith.constant 0 : i32
    return %1, %c0_i32, %c0_i32_0 : i32, i32, i32
  }
  func.func @transform_4(%arg0: i32, %arg1: memref<2xi32, #tpu.memory_space<smem>>, %arg2: memref<2xi32, #tpu.memory_space<smem>>) -> (i32, i32, i32) {
    %c0_i32 = arith.constant 0 : i32
    %c0_i32_0 = arith.constant 0 : i32
    %c0_i32_1 = arith.constant 0 : i32
    return %arg0, %c0_i32, %c0_i32_0 : i32, i32, i32
  }
  func.func @transform_5(%arg0: i32, %arg1: memref<2xi32, #tpu.memory_space<smem>>, %arg2: memref<2xi32, #tpu.memory_space<smem>>) -> (i32, i32, i32) {
    %c0_i32 = arith.constant 0 : i32
    %c0_i32_0 = arith.constant 0 : i32
    %c0_i32_1 = arith.constant 0 : i32
    return %arg0, %c0_i32, %c0_i32_0 : i32, i32, i32
  }
}

</mosaic_0001>

<bundles_post_ra>
// kernel: tpu_custom_call.1
= control target key start
LH: loop header
LB: loop body
LE: loop exit
PB: predicated region body
PF: predicated region fallthrough
CT: control target
= control target key end

     0   :  { %s1780_s0 = inlined_call_operand.vmem [shape: s32[2], index: 0, kind: input, shape index: {}]   ;;  %s1781_s2 = inlined_call_operand.vmem [shape: f32[4,32,16], index: 2, kind: input, shape index: {}]   ;;  %s1782_s3 = inlined_call_operand.vmem [shape: f32[4,16,1], index: 3, kind: input, shape index: {}]   ;;  %s1783_s4 = inlined_call_operand.vmem [shape: f32[4,32,256], index: 4, kind: input, shape index: {}]   ;;  %s1784_s5 = inlined_call_operand.vmem [shape: f32[4,1,256], index: 5, kind: input, shape index: {}]   ;;  %s1785_s6 = inlined_call_operand.vmem [shape: f32[2,16,2], index: 6, kind: output, shape index: {0}]   ;;  %s1786_s7 = inlined_call_operand.vmem [shape: f32[2,16,1], index: 7, kind: output, shape index: {1}]   ;;  %s1787_s1 = inlined_call_operand.vmem [shape: s32[2], index: 1, kind: input, shape index: {}]  }
   0x1   :  { %s13_s26 = sshll.u32 %s1780_s0, 4  ;;  %s17_s29 = sshll.u32 %s1787_s1, 4  ;;  %s14_s26 = int_to_ptr.vmem [resolvable:$true] %s13_s26  ;;  %s18_s29 = int_to_ptr.vmem [resolvable:$true] %s17_s29 }
   0x2   :  { %s1492_s30 = scalar_lea.vmem %s14_s26, 16  ;;  %p1497_p1 = scmp.lt.s32.totalorder %s14_s26, %s14_s26 }
   0x3   :  { %p1493_p0 = scmp.ne.s32.totalorder %s14_s26, %s1492_s30  ;;  %p1498_p2 = scmp.lt.s32.totalorder %s1492_s30, %s1492_s30 }
   0x5   :  { %p1499_p3 = por %p1498_p2, %p1497_p1 }
   0x7   :  { %p1500_p4 = pnand %p1499_p3, %p1493_p0 }
   0x9   :  { %1503 = shalt.err (!%p1500_p4)  }
   0xa   :  { %s1526_s8 = smov [#allocation3]   ;;  %s1504_s9 = scalar_lea.vmem %s18_s29, 16 }
   0xb   :  { %16 = dma.vmem_to_smem %s14_s26, 16, %s1526_s8, [#allocation2] }
   0xc   :  { %p1505_p5 = scmp.ne.s32.totalorder %s18_s29, %s1504_s9  ;;  %p1509_p6 = scmp.lt.s32.totalorder %s18_s29, %s18_s29 }
   0xd   :  { %p1510_p7 = scmp.lt.s32.totalorder %s1504_s9, %s1504_s9 }
   0xf   :  { %p1511_p8 = por %p1510_p7, %p1509_p6 }
  0x11   :  { %p1512_p9 = pnand %p1511_p8, %p1505_p5 }
  0x13   :  { %1515 = shalt.err (!%p1512_p9)  }
  0x14   :  { %s1527_s0 = smov [#allocation4]  }
  0x15   :  { %20 = dma.vmem_to_smem %s18_s29, 16, %s1527_s0, [#allocation2] }
  0x16   :  { %1520 = dma.done.wait [#allocation2], 32 }
  0x17   :  { %1521 = vsyncadd [#allocation2], 4294967264 }
  0x18   :  { %22 = sfence }
  0x19   :  { %s1575_s1 = smov 0  }
  0x1a LB: > { %s1581_s10 = sadd.s32 4294967295, %s1524_s1   ;;  %p1364_p10 = scmp.ge.s32.totalorder %s1524_s1, 1  ;;  %s1524_s1 = sphi %s1575_s1, %s28_s1  }
  0x1b   : > { %p247_p11 = scmp.lt.s32.totalorder %s1524_s1, 3 }
  0x1d   : > { %p248_p12 = pnand %p1364_p10, %p247_p11 }
  0x1e   : > { %s298_s11 = sld [smem:[#allocation3 + %s1581_s10]] (!%p248_p12)  ;;  %vm351_vm0 = vcmask (!%p248_p12), 130048   ;;  %vm448_vm1 = vcmask (!%p248_p12), 261120   ;;  %p325_p1 = scmp.lt.s32.totalorder (!%p248_p12), %s1581_s10, 1  ;;  %vm1120_vm2 = vcmask (!%p248_p12), 7168   ;;  %vm1123_vm3 = vcmask (!%p248_p12), 15368  }
  0x1f   : > { %251 = sbr.rel (%p248_p12) target bundleno = 964 (0x3c4), region = 36  ;;  %s312_s12 = sld [smem:[#allocation4 + %s1581_s10]] (!%p248_p12) }
  0x20   : > { %s1723_s26 = sld [smem:[#allocation4 + %s1581_s10]] (!%p248_p12) }
  0x21   : > { %s305_s8 = sld [smem:[#allocation3 + %s1581_s10]] (!%p248_p12) }
  0x24   : > { %p299_p13 = scmp.lt.s32.totalorder (!%p248_p12), %s298_s11, 3 }
  0x25   : > { %p313_p0 = scmp.lt.s32.totalorder (!%p248_p12), %s312_s12, 3 }
  0x26   : > { %s1789_s11 = smov (!%p299_p13, %s298_s11), 3  ;;  %p320_p2 = scmp.lt.s32.totalorder %s1723_s26, 3 }
  0x27   : > { %s1791_s12 = smov (!%p313_p0, %s312_s12), 3  ;;  %s1382_s13 = sshll.u32 %s1789_s11, 5 }
  0x28   : > { %s303_s16 = scalar_lea.vmem %s1781_s2, %s1382_s13  ;;  %s1384_s17 = sshll.u32 %s1791_s12, 6 }
  0x29   : > { %v335_v0 = vld [vmem:[%s303_s16] sm:$0xff]  ;;  %v336_v1 = vld [vmem:[%s303_s16 + $0x8] sm:$0xff]  ;;  %v337_v2 = vld [vmem:[%s303_s16 + $0x10] sm:$0xff]  ;;  %s1593_s20 = scalar_lea.vmem %s1783_s4, %s1384_s17  ;;  %s1793_s26 = smov (!%p320_p2, %s1723_s26), 3 }
  0x2a   : > { %v338_v3 = vld [vmem:[%s303_s16 + $0x18] sm:$0xff]  ;;  %v347_v4 = vmul.f32 %v335_v0, %v335_v0  ;;  %v348_v5 = vmul.f32 %v336_v1, %v336_v1  ;;  %v349_v6 = vmul.f32 %v337_v2, %v337_v2  ;;  %v340_v7 = vld [vmem:[%s1593_s20 + $0x8] sm:$0xff]  ;;  %v339_v36 = vld [vmem:[%s1593_s20] sm:$0xff]  ;;  %s1714_s21 = scalar_select %p325_p1, %s1581_s10, 1 }
  0x2b   : > { %v342_v8 = vld [vmem:[%s1593_s20 + $0x18] sm:$0xff]  ;;  %v350_v9 = vmul.f32 %v338_v3, %v338_v3  ;;  %v373_v10 = vmul.f32 %v340_v7, %v340_v7  ;;  %v455_v12 = vand.u32 4294901760, %v340_v7  ;;  %v341_v37 = vld [vmem:[%s1593_s20 + $0x10] sm:$0xff]  ;;  %v457_v38 = vand.u32 4294901760, %v339_v36  ;;  %v344_v42 = vld [vmem:[%s1593_s20 + $0x28] sm:$0xff]  ;;  %s1371_s27 = sshll.u32 %s1793_s26, 1 }
  0x2c   : > { %v375_v11 = vmul.f32 %v342_v8, %v342_v8  ;;  %v352_v13 = vsel %vm351_vm0, %v347_v4, 0.0  ;;  %v353_v14 = vsel %vm351_vm0, %v348_v5, 0.0  ;;  %v355_v15 = vsel %vm351_vm0, %v349_v6, 0.0  ;;  %v346_v43 = vld [vmem:[%s1593_s20 + $0x38] sm:$0xff]  ;;  %v343_v47 = vld [vmem:[%s1593_s20 + $0x20] sm:$0xff]  ;;  %v345_v48 = vld [vmem:[%s1593_s20 + $0x30] sm:$0xff]  ;;  %s323_s30 = scalar_lea.vmem %s1784_s5, %s1371_s27 }
  0x2d   : > { %v459_v16 = vand.u32 4294901760, %v342_v8  ;;  %v354_v17 = vadd.f32 %v353_v14, %v352_v13  ;;  %v357_v19 = vsel %vm351_vm0, %v350_v9, 0.0  ;;  %v461_v39 = vand.u32 4294901760, %v341_v37  ;;  %s1385_s22 = sshll.u32 %s1714_s21, 4  ;;  %p306_p3 = scmp.lt.s32.totalorder %s305_s8, 3 }
  0x2e   : > { %v389_v18 = vadd.f32 %v375_v11, %v373_v10  ;;  %v463_v45 = vand.u32 4294901760, %v344_v42  ;;  %v467_v46 = vand.u32 4294901760, %v346_v43  ;;  %v1613_v49 = vsub.f32 %v340_v7, %v455_v12  ;;  %s329_s25 = scalar_lea.vmem %s1785_s6, %s1385_s22  ;;  %s334_s10 = scalar_lea.vmem %s1786_s7, %s1385_s22 }
  0x2f   : > { %v1601_v20 = vpack.c.bf16 %v459_v16, %v455_v12  ;;  %v356_v21 = vadd.f32 %v355_v15, %v354_v17  ;;  %v1607_v41 = vpack.c.bf16 %v461_v39, %v457_v38  ;;  %v1615_v50 = vsub.f32 %v342_v8, %v459_v16  ;;  %s1795_s8 = smov (!%p306_p3, %s305_s8), 3 }
  0x30   : > { %v465_v51 = vand.u32 4294901760, %v343_v47  ;;  %v469_v52 = vand.u32 4294901760, %v345_v48  ;;  %v1619_v54 = vpack.c.bf16 %v467_v46, %v463_v45  ;;  %v1621_v56 = vsub.f32 %v339_v36, %v457_v38  ;;  %s1383_s9 = sshll.u32 %s1795_s8, 4 }
  0x31   : > { %1412 = vmatprep.subr.bf16.mxu0 %v1601_v20  ;;  %1388 = vmatprep.subr.bf16.mxu1 %v1601_v20  ;;  %v358_v22 = vadd.f32 %v357_v19, %v356_v21  ;;  %v1623_v57 = vsub.f32 %v341_v37, %v461_v39  ;;  %v372_v59 = vmul.f32 %v339_v36, %v339_v36  ;;  %v1528_v8 = vmov 0.0   ;;  %s310_s12 = scalar_lea.vmem %s1782_s3, %s1383_s9 }
  0x32   : > { %1414 = vmatpush1.bf16.msra.mxu0 %v1607_v41  ;;  %1390 = vmatpush1.bf16.msra.mxu1 %v1607_v41  ;;  %v1625_v58 = vpack.c.bf16 %v469_v52, %v465_v51  ;;  %v374_v60 = vmul.f32 %v341_v37, %v341_v37  ;;  %v377_v61 = vmul.f32 %v344_v42, %v344_v42  ;;  %v558_v5 = vand.u32 4294901760, %v1621_v56 }
  0x33   : > { %v359_v23 = vrot.slane %v358_v22, 4  ;;  %v379_v62 = vmul.f32 %v346_v43, %v346_v43  ;;  %v1627_v63 = vsub.f32 %v344_v42, %v463_v45  ;;  %1416 = vmatprep.subr.bf16.mxu0 %v1619_v54  ;;  %1392 = vmatprep.subr.bf16.mxu1 %v1619_v54  ;;  %v1638_v6 = vsub.f32 %v343_v47, %v465_v51 }
  0x34   : > { %v390_v4 = vadd.f32 %v389_v18, %v377_v61  ;;  %v1640_v7 = vsub.f32 %v345_v48, %v469_v52  ;;  %838 = vmatprep.mubr.f32.mxu0 %v1528_v8  ;;  %v570_v10 = vand.u32 4294901760, %v1623_v57  ;;  %527 = vmatprep.mubr.f32.mxu1 %v1528_v8  ;;  %v376_v12 = vmul.f32 %v343_v47, %v343_v47 }
  0x35   : > { %v360_v24 = vadd.f32 %v359_v23, %v358_v22  ;;  %v378_v13 = vmul.f32 %v345_v48, %v345_v48  ;;  %v559_v17 = vsub.f32 %v1621_v56, %v558_v5  ;;  %v576_v22 = vand.u32 4294901760, %v1627_v63 }
  0x36   : > { %1418 = vmatpush1.bf16.msra.mxu0 %v1625_v58  ;;  %1394 = vmatpush1.bf16.msra.mxu1 %v1625_v58  ;;  %v1645_v11 = vadd.f32 %v390_v4, %v379_v62  ;;  %v1421_v15 = vpack.c.bf16 %v570_v10, %v558_v5  ;;  %v571_v18 = vsub.f32 %v1623_v57, %v570_v10 }
  0x37   : > { %v361_v25 = vrot.slane %v360_v24, 2  ;;  %v1409_v48 = vpack.c.bf16 %v1640_v7, %v1638_v6 }
  0x39   : > { %v362_v26 = vadd.f32 %v361_v25, %v360_v24  ;;  %v560_v24 = vand.u32 4294901760, %v559_v17  ;;  %v572_v25 = vand.u32 4294901760, %v571_v18 }
  0x3b   : > { %v363_v27 = vrot.slane %v362_v26, 1 }
  0x3d   : > { %v364_v28 = vadd.f32 %v363_v27, %v362_v26 }
  0x3f   : > { %v365_v29 = vmax.f32 %v364_v28, 1e-24  ;;  %v582_v28 = vand.u32 4294901760, %v1638_v6 }
  0x41   : > { %1474 = vrsqrt.f32 %v365_v29  ;;  %v367_v30 = vmul.f32 0.5, %v365_v29  ;;  %v594_v29 = vand.u32 4294901760, %v1640_v7  ;;  %v583_v37 = vsub.f32 %v1638_v6, %v582_v28 }
  0x43   : > { %v595_v38 = vsub.f32 %v1640_v7, %v594_v29 }
  0x45   : > { %v596_v42 = vand.u32 4294901760, %v595_v38 }
  0x4b   : > { %v1475_v31 = vpop.eup %1474 }
  0x4c   : > { %v368_v32 = vmul.f32 %v1475_v31, %v367_v30 }
  0x4e   : > { %v369_v33 = vmul.f32 %v1475_v31, %v368_v32 }
  0x50   : > { %v370_v34 = vsub.f32 1.5, %v369_v33  ;;  %v577_v33 = vsub.f32 %v1627_v63, %v576_v22 }
  0x52   : > { %v371_v35 = vmul.f32 %v1475_v31, %v370_v34  ;;  %v1397_v31 = vpack.c.bf16 %v572_v25, %v560_v24  ;;  %v1425_v34 = vpack.c.bf16 %v594_v29, %v582_v28  ;;  %v578_v36 = vand.u32 4294901760, %v577_v33 }
  0x54   : > { %v412_v40 = vmul.f32 %v371_v35, %v335_v0  ;;  %v413_v44 = vmul.f32 %v371_v35, %v336_v1  ;;  %v414_v53 = vmul.f32 %v371_v35, %v337_v2  ;;  %v415_v55 = vmul.f32 %v371_v35, %v338_v3 }
  0x55   : > { %v1629_v0 = vsub.f32 %v346_v43, %v467_v46  ;;  %v552_v1 = vand.u32 4294901760, %v1613_v49  ;;  %v564_v2 = vand.u32 4294901760, %v1615_v50  ;;  %v380_v3 = vadd.f32 %v374_v60, %v372_v59 }
  0x56   : > { %416 = vxpose.xlu0.b32.start [1/4] (short) (narrow) %v412_v40, 16  ;;  %v584_v40 = vand.u32 4294901760, %v583_v37  ;;  %v1405_v46 = vpack.c.bf16 %v1623_v57, %v1621_v56 }
  0x57   : > { %v1419_v9 = vpack.c.bf16 %v564_v2, %v552_v1  ;;  %v553_v14 = vsub.f32 %v1613_v49, %v552_v1  ;;  %v565_v16 = vsub.f32 %v1615_v50, %v564_v2  ;;  %v381_v19 = vadd.f32 %v380_v3, %v376_v12 }
  0x58   : > { %v588_v26 = vand.u32 4294901760, %v1629_v0  ;;  %v1401_v45 = vpack.c.bf16 %v596_v42, %v584_v40  ;;  %v1407_v47 = vpack.c.bf16 %v1629_v0, %v1627_v63 }
  0x59   : > { %1420 = vmatprep.subr.bf16.mxu0 %v1419_v9  ;;  %v554_v21 = vand.u32 4294901760, %v553_v14  ;;  %v566_v23 = vand.u32 4294901760, %v565_v16  ;;  %v1653_v27 = vadd.f32 %v381_v19, %v378_v13 }
  0x5a   : > { %417 = vxpose.xlu0.b32.cont [2/4] (short) (narrow) %v413_v44, 16  ;;  %v1423_v32 = vpack.c.bf16 %v588_v26, %v576_v22  ;;  %v589_v35 = vsub.f32 %v1629_v0, %v588_v26  ;;  %v1403_v44 = vpack.c.bf16 %v1615_v50, %v1613_v49 }
  0x5b   : > { %v1395_v30 = vpack.c.bf16 %v566_v23, %v554_v21 }
  0x5c   : > { %v590_v39 = vand.u32 4294901760, %v589_v35 }
  0x5d   : > { %1396 = vmatprep.subr.bf16.mxu1 %v1395_v30 }
  0x5e   : > { %418 = vxpose.xlu0.b32.cont [3/4] (short) (narrow) %v414_v53, 16  ;;  %v1399_v43 = vpack.c.bf16 %v590_v39, %v578_v36 }
  0x62   : > { %419 = vxpose.xlu0.b32.end [4/4] (short) (narrow) %v415_v55, 16 }
  0xd6   : > { %v432_v51 = vpop.trf.xlu0 }
  0xd7   : > { %v450_v52 = vsel %vm448_vm1, %v432_v51, 0 }
  0xd8   : > { %v528_v53 = vand.u32 4294901760, %v450_v52 }
  0xda   : > { %v529_v55 = vsub.f32 %v450_v52, %v528_v53  ;;  %v433_v59 = vpop.trf.xlu0 }
  0xdb   : > { %v453_v60 = vsel %vm448_vm1, %v433_v59, 0 }
  0xdc   : > { %v539_v61 = vand.u32 4294901760, %v453_v60  ;;  %v530_v62 = vand.u32 4294901760, %v529_v55 }
  0xde   : > { %v540_v49 = vsub.f32 %v453_v60, %v539_v61  ;;  %842 = vmatmul.mubr.f32.vlgmr.msra.gmra.mrb[0].mxu0 %v530_v62  ;;  %v531_v50 = vsub.f32 %v529_v55, %v530_v62 }
  0xdf   : > { %1422 = vmatpush1.bf16.msra.mxu0 %v1421_v15  ;;  %847 = vmatprep.mubr.f32.mxu0 %v1528_v8 }
  0xe0   : > { %v532_v56 = vand.u32 4294901760, %v531_v50  ;;  %v541_v57 = vand.u32 4294901760, %v540_v49  ;;  %1424 = vmatprep.subr.bf16.mxu0 %v1423_v32 }
  0xe2   : > { %533 = vmatmul.mubr.f32.vlgmr.msra.gmra.mrb[0].mxu1 %v532_v56  ;;  %851 = vmatmul.mubr.f32.gmra.mrb[2].mxu0 %v541_v57  ;;  %v542_v63 = vsub.f32 %v540_v49, %v541_v57 }
  0xe3   : > { %1398 = vmatpush1.bf16.msra.mxu1 %v1397_v31  ;;  %1426 = vmatpush1.bf16.msra.mxu0 %v1425_v34 }
  0xe4   : > { %538 = vmatprep.mubr.f32.mxu1 %v1528_v8  ;;  %1400 = vmatprep.subr.bf16.mxu1 %v1399_v43  ;;  %v543_v0 = vand.u32 4294901760, %v542_v63 }
  0xe5   : > { %945 = vmatprep.mubr.f32.mxu0 %v1528_v8  ;;  %1428 = vmatprep.subr.bf16.mxu0 %v1601_v20  ;;  %v383_v20 = vrot.slane %v1653_v27, 4 }
  0xe6   : > { %544 = vmatmul.mubr.f32.gmra.mrb[2].mxu1 %v543_v0  ;;  %947 = vmatmul.mubr.f32.vlgmr.msra.gmra.mrb[0].mxu0 %v528_v53 }
  0xe7   : > { %1402 = vmatpush1.bf16.msra.mxu1 %v1401_v45  ;;  %1430 = vmatpush1.bf16.msra.mxu0 %v1607_v41  ;;  %v392_v41 = vrot.slane %v1645_v11, 4  ;;  %v1085_v45 = vlaneseq }
  0xe8   : > { %654 = vmatprep.mubr.f32.mxu1 %v1528_v8  ;;  %1404 = vmatprep.subr.bf16.mxu1 %v1403_v44 }
  0xe9   : > { %952 = vmatprep.mubr.f32.mxu0 %v1528_v8  ;;  %1432 = vmatprep.subr.bf16.mxu0 %v1619_v54  ;;  %v384_v54 = vadd.f32 %v383_v20, %v1653_v27  ;;  %v1086_v51 = vand.u32 127, %v1085_v45 }
  0xea   : > { %656 = vmatmul.mubr.f32.vlgmr.msra.gmra.mrb[0].mxu1 %v528_v53  ;;  %954 = vmatmul.mubr.f32.gmra.mrb[2].mxu0 %v539_v61 }
  0xeb   : > { %1406 = vmatpush1.bf16.msra.mxu1 %v1405_v46  ;;  %1434 = vmatpush1.bf16.msra.mxu0 %v1625_v58  ;;  %v393_v58 = vadd.f32 %v392_v41, %v1645_v11  ;;  %v385_v1 = vrot.slane %v384_v54, 2  ;;  %v1700_v50 = vand.u32 15, %v1086_v51  ;;  %v1706_v0 = vshra.s32 %v1086_v51, 4 }
  0xec   : > { %661 = vmatprep.mubr.f32.mxu1 %v1528_v8  ;;  %1408 = vmatprep.subr.bf16.mxu1 %v1407_v47 }
  0xed   : > { %1032 = vmatprep.mubr.f32.mxu0 %v1528_v8  ;;  %v394_v2 = vrot.slane %v393_v58, 2  ;;  %v386_v3 = vadd.f32 %v385_v1, %v384_v54  ;;  %v1092_v57 = vcvt.s32.f32 %v1700_v50 }
  0xee   : > { %663 = vmatmul.mubr.f32.gmra.mrb[2].mxu1 %v539_v61  ;;  %1034 = vmatmul.mubr.f32.vlgmr.msra.gmra.mrb[0].mxu0 %v528_v53 }
  0xef   : > { %1410 = vmatpush1.bf16.msra.mxu1 %v1409_v48  ;;  %749 = vmatprep.mubr.f32.mxu1 %v1528_v8  ;;  %v395_v4 = vadd.f32 %v394_v2, %v393_v58  ;;  %v387_v5 = vrot.slane %v386_v3, 1 }
  0xf0   : > { %1039 = vmatprep.mubr.f32.mxu0 %v1528_v8 }
  0xf1   : > { %v396_v6 = vrot.slane %v395_v4, 1  ;;  %v388_v7 = vadd.f32 %v387_v5, %v386_v3  ;;  %v1094_v3 = vcvt.s32.f32 %v1706_v0 }
  0xf2   : > { %752 = vmatmul.mubr.f32.vlgmr.msra.gmra.mrb[0].mxu1 %v529_v55  ;;  %1041 = vmatmul.mubr.f32.gmra.mrb[2].mxu0 %v539_v61  ;;  %v1087_v61 = vadd.s32 128, %v1086_v51 }
  0xf3   : > { %757 = vmatprep.mubr.f32.mxu1 %v1528_v8  ;;  %v397_v9 = vadd.f32 %v396_v6, %v395_v4  ;;  %v398_v10 = vmax.f32 %v388_v7, 1e-24 }
  0xf4   : > { %v1702_v56 = vand.u32 15, %v1087_v61  ;;  %v1708_v20 = vshra.s32 %v1087_v61, 4 }
  0xf5   : > { %v399_v12 = vmax.f32 %v397_v9, 1e-24  ;;  %1476 = vrsqrt.f32 %v398_v10  ;;  %v402_v8 = vmul.f32 0.5, %v398_v10 }
  0xf6   : > { %760 = vmatmul.mubr.f32.gmra.mrb[2].mxu1 %v540_v49  ;;  %v1093_v63 = vcvt.s32.f32 %v1702_v56  ;;  %v1095_v4 = vcvt.s32.f32 %v1708_v20 }
  0xf7   : > { %1478 = vrsqrt.f32 %v399_v12  ;;  %v403_v14 = vmul.f32 0.5, %v399_v12 }
  0xff   : > { %v1477_v13 = vpop.eup %1476 }
 0x100   : > { %v404_v16 = vmul.f32 %v1477_v13, %v402_v8 }
 0x101   : > { %v1479_v15 = vpop.eup %1478 }
 0x102   : > { %v405_v17 = vmul.f32 %v1479_v15, %v403_v14  ;;  %v406_v18 = vmul.f32 %v1477_v13, %v404_v16 }
 0x104   : > { %v407_v11 = vmul.f32 %v1479_v15, %v405_v17  ;;  %v408_v19 = vsub.f32 1.5, %v406_v18 }
 0x106   : > { %v409_v21 = vsub.f32 1.5, %v407_v11  ;;  %v410_v22 = vmul.f32 %v1477_v13, %v408_v19 }
 0x108   : > { %v411_v24 = vmul.f32 %v1479_v15, %v409_v21  ;;  %v1047_v26 = vmul.f32 100.0, %v410_v22 }
 0x10a   : > { %v1048_v29 = vmul.f32 100.0, %v411_v24 }
 0x1c1   : > { %v1035_v23 = vpop.f32.mrb[0].mxu0 }
 0x1c2   : > { %v1037_v25 = vpop.f32.mrb[1].mxu0 }
 0x1c5   : > { %v753_v27 = vpop.f32.mrb[0].mxu1  ;;  %v1042_v28 = vpop.f32.mrb[2].mxu0 }
 0x1c6   : > { %v1687_v30 = vadd.f32 %v1035_v23, %v753_v27  ;;  %v755_v31 = vpop.f32.mrb[1].mxu1  ;;  %v1044_v32 = vpop.f32.mrb[3].mxu0 }
 0x1c7   : > { %v1689_v33 = vadd.f32 %v1037_v25, %v755_v31 }
 0x1c8   : > { %v1049_v34 = vmul.f32 %v1687_v30, %v1047_v26 }
 0x1c9   : > { %v761_v35 = vpop.f32.mrb[2].mxu1  ;;  %v1050_v36 = vmul.f32 %v1689_v33, %v1048_v29 }
 0x1ca   : > { %v1693_v37 = vadd.f32 %v1042_v28, %v761_v35  ;;  %v763_v38 = vpop.f32.mrb[3].mxu1 }
 0x1cb   : > { %v1695_v39 = vadd.f32 %v1044_v32, %v763_v38  ;;  %v1053_v40 = vmax.f32 %v1049_v34, %v1050_v36 }
 0x1cc   : > { %v1051_v42 = vmul.f32 %v1693_v37, %v1047_v26 }
 0x1cd   : > { %v1052_v43 = vmul.f32 %v1695_v39, %v1048_v29  ;;  %1054 = vmax.xlane.f32.xlu1 %v1053_v40 }
 0x1cf   : > { %v1056_v44 = vmax.f32 %v1051_v42, %v1052_v43 }
 0x1d1   : > { %1057 = vmax.xlane.f32.xlu1 %v1056_v44 }
 0x25a   : > { %v1055_v46 = vpop.xlane.xlu1 %1054 }
 0x25b   : > { %v1059_v47 = vsub.f32 %v1049_v34, %v1055_v46  ;;  %v1060_v48 = vsub.f32 %v1050_v36, %v1055_v46 }
 0x25d   : > { %v1063_v52 = vmul.f32 1.442695, %v1059_v47  ;;  %v1065_v53 = vmul.f32 1.442695, %v1060_v48  ;;  %v1728_v47 = vshrl.u32 %v1085_v45, 7 }
 0x25e   : > { %v1058_v55 = vpop.xlane.xlu1 %1057 }
 0x25f   : > { %1480 = vpow2.f32 %v1063_v52  ;;  %v1061_v59 = vsub.f32 %v1051_v42, %v1058_v55  ;;  %v1062_v60 = vsub.f32 %v1052_v43, %v1058_v55 }
 0x260   : > { %1482 = vpow2.f32 %v1065_v53 }
 0x261   : > { %v1067_v62 = vmul.f32 1.442695, %v1061_v59  ;;  %v1069_v49 = vmul.f32 1.442695, %v1062_v60 }
 0x263   : > { %1484 = vpow2.f32 %v1067_v62 }
 0x264   : > { %1486 = vpow2.f32 %v1069_v49 }
 0x269   : > { %v1481_v41 = vpop.eup %1480 }
 0x26a   : > { %v1483_v54 = vpop.eup %1482  ;;  %v1096_v58 = vmul.f32 %v1481_v41, %v1092_v57  ;;  %v1108_v10 = vmul.f32 %v1481_v41, %v1094_v3 }
 0x26b   : > { %v1071_v1 = vadd.f32 %v1483_v54, %v1481_v41  ;;  %v1097_v2 = vmul.f32 %v1483_v54, %v1093_v63  ;;  %v1109_v12 = vmul.f32 %v1483_v54, %v1095_v4 }
 0x26d   : > { %v1485_v5 = vpop.eup %1484  ;;  %1072 = vadd.xlane.f32.xlu1 %v1071_v1  ;;  %v1100_v6 = vadd.f32 %v1097_v2, %v1096_v58  ;;  %v1112_v8 = vadd.f32 %v1109_v12, %v1108_v10  ;;  %v1198_v1 = vsub.s32 1, %v1728_v47 }
 0x26e   : > { %v1487_v7 = vpop.eup %1486  ;;  %v1098_v13 = vmul.f32 %v1485_v5, %v1092_v57  ;;  %v1110_v16 = vmul.f32 %v1485_v5, %v1094_v3 }
 0x26f   : > { %1101 = vadd.xlane.f32.xlu0 %v1100_v6  ;;  %v1074_v9 = vadd.f32 %v1487_v7, %v1485_v5  ;;  %v1099_v14 = vmul.f32 %v1487_v7, %v1093_v63  ;;  %v1111_v17 = vmul.f32 %v1487_v7, %v1095_v4  ;;  %v1194_v63 = vsub.s32 0, %v1728_v47 }
 0x271   : > { %1075 = vadd.xlane.f32.xlu1 %v1074_v9  ;;  %v1103_v15 = vadd.f32 %v1099_v14, %v1098_v13  ;;  %v1115_v18 = vadd.f32 %v1111_v17, %v1110_v16 }
 0x275   : > { %1113 = vadd.xlane.f32.xlu1 %v1112_v8 }
 0x279   : > { %1104 = vadd.xlane.f32.xlu1 %v1103_v15 }
 0x27d   : > { %1116 = vadd.xlane.f32.xlu1 %v1115_v18 }
 0x2fa   : > { %v1073_v11 = vpop.xlane.xlu1 %1072 }
 0x2fb   : > { %1488 = vrcp.f32 %v1073_v11 }
 0x2fc   : > { %v1102_v29 = vpop.xlane.xlu0 %1101 }
 0x2fe   : > { %v1076_v19 = vpop.xlane.xlu1 %1075 }
 0x2ff   : > { %1490 = vrcp.f32 %v1076_v19 }
 0x302   : > { %v1114_v21 = vpop.xlane.xlu1 %1113 }
 0x305   : > { %v1489_v22 = vpop.eup %1488 }
 0x306   : > { %v1079_v23 = vmul.f32 %v1489_v22, %v1073_v11  ;;  %v1105_v26 = vpop.xlane.xlu1 %1104 }
 0x308   : > { %v1081_v24 = vsub.f32 2.0, %v1079_v23 }
 0x309   : > { %v1491_v25 = vpop.eup %1490 }
 0x30a   : > { %v1083_v27 = vmul.f32 %v1489_v22, %v1081_v24  ;;  %v1080_v28 = vmul.f32 %v1491_v25, %v1076_v19  ;;  %v1117_v40 = vpop.xlane.xlu1 %1116 }
 0x30c   : > { %v1106_v31 = vmul.f32 %v1102_v29, %v1083_v27  ;;  %v1082_v32 = vsub.f32 2.0, %v1080_v28  ;;  %v1118_v34 = vmul.f32 %v1114_v21, %v1083_v27 }
 0x30e   : > { %1121 = vst.msk [vmem:[%s329_s25] sm:$0xff] %vm1120_vm2, %v1106_v31  ;;  %v1126_v35 = vmul.f32 1.0666667, %v1106_v31  ;;  %v1130_v36 = vmul.f32 1.0666667, %v1118_v34  ;;  %v1084_v38 = vmul.f32 %v1491_v25, %v1082_v32 }
 0x30f   : > { %1124 = vst.msk [vmem:[%s329_s25] sm:$0xff] %vm1123_vm3, %v1118_v34  ;;  %v1190_v34 = vld [vmem:[%s323_s30] sm:$0x3] }
 0x310   : > { %v1376_v42 = vadd.f32 -0.5, %v1126_v35  ;;  %v1378_v43 = vadd.f32 -0.5, %v1130_v36  ;;  %v1107_v44 = vmul.f32 %v1105_v26, %v1084_v38  ;;  %v1119_v46 = vmul.f32 %v1117_v40, %v1084_v38 }
 0x311   : > { %v1195_v40 = vrot.slane %v1190_v34, %v1194_v63 }
 0x312   : > { %v1134_v48 = vfloor.f32 %v1376_v42  ;;  %v1136_v51 = vfloor.f32 %v1378_v43  ;;  %1122 = vst.msk [vmem:[%s329_s25 + $0x8] sm:$0xff] %vm1120_vm2, %v1107_v44  ;;  %v1127_v52 = vmul.f32 1.0666667, %v1107_v44  ;;  %v1131_v53 = vmul.f32 1.0666667, %v1119_v46 }
 0x313   : > { %1125 = vst.msk [vmem:[%s329_s25 + $0x8] sm:$0xff] %vm1123_vm3, %v1119_v46 }
 0x314   : > { %v1138_v55 = vsub.f32 %v1376_v42, %v1134_v48  ;;  %v1455_v59 = vtrunc.f32 %v1134_v48  ;;  %v1140_v60 = vsub.f32 %v1378_v43, %v1136_v51  ;;  %v1459_v61 = vtrunc.f32 %v1136_v51 }
 0x315   : > { %v1377_v62 = vadd.f32 -0.5, %v1127_v52  ;;  %v1379_v49 = vadd.f32 -0.5, %v1131_v53  ;;  %v1199_v42 = vrot.slane %v1190_v34, %v1198_v1 }
 0x316   : > { %v1456_v57 = vcvt.f32.s32 %v1455_v59  ;;  %v1460_v45 = vcvt.f32.s32 %v1459_v61  ;;  %v1172_v41 = vsub.f32 1.0, %v1138_v55  ;;  %v1154_v2 = vsub.f32 1.0, %v1140_v60 }
 0x317   : > { %v1135_v54 = vfloor.f32 %v1377_v62  ;;  %v1137_v58 = vfloor.f32 %v1379_v49 }
 0x318   : > { %v1146_v3 = vadd.s32 1, %v1456_v57  ;;  %v1148_v4 = vadd.s32 1, %v1460_v45  ;;  %vm1150_vm4 = vcmp.eq.s32.totalorder %v1706_v0, %v1460_v45  ;;  %vm1151_vm5 = vcmp.eq.s32.totalorder %v1708_v20, %v1460_v45  ;;  %v1229_v45 = vld [vmem:[%s310_s12 + $0x8] sm:$0xff] }
 0x319   : > { %v1139_v5 = vsub.f32 %v1377_v62, %v1135_v54  ;;  %v1457_v6 = vtrunc.f32 %v1135_v54  ;;  %v1461_v7 = vtrunc.f32 %v1137_v58  ;;  %v1141_v9 = vsub.f32 %v1379_v49, %v1137_v58 }
 0x31a   : > { %vm1156_vm6 = vcmp.eq.s32.totalorder %v1706_v0, %v1148_v4  ;;  %vm1157_vm7 = vcmp.eq.s32.totalorder %v1708_v20, %v1148_v4  ;;  %vm1168_vm8 = vcmp.eq.s32.totalorder %v1700_v50, %v1456_v57  ;;  %vm1169_vm9 = vcmp.eq.s32.totalorder %v1702_v56, %v1456_v57 }
 0x31b   : > { %v1458_v10 = vcvt.f32.s32 %v1457_v6  ;;  %v1173_v12 = vsub.f32 1.0, %v1139_v5  ;;  %v1462_v8 = vcvt.f32.s32 %v1461_v7  ;;  %v1160_v13 = vsel %vm1156_vm6, %v1140_v60, 0.0 }
 0x31c   : > { %v1161_v14 = vsel %vm1157_vm7, %v1140_v60, 0.0  ;;  %vm1174_vm10 = vcmp.eq.s32.totalorder %v1700_v50, %v1146_v3  ;;  %vm1175_vm11 = vcmp.eq.s32.totalorder %v1702_v56, %v1146_v3  ;;  %v1164_v15 = vsel %vm1150_vm4, %v1154_v2, %v1160_v13 }
 0x31d   : > { %v1165_v16 = vsel %vm1151_vm5, %v1154_v2, %v1161_v14  ;;  %v1178_v17 = vsel %vm1174_vm10, %v1138_v55, 0.0  ;;  %v1179_v18 = vsel %vm1175_vm11, %v1138_v55, 0.0  ;;  %v1147_v21 = vadd.s32 1, %v1458_v10 }
 0x31e   : > { %v1182_v11 = vsel %vm1168_vm8, %v1172_v41, %v1178_v17  ;;  %v1183_v19 = vsel %vm1169_vm9, %v1172_v41, %v1179_v18  ;;  %v1149_v22 = vadd.s32 1, %v1462_v8  ;;  %v1155_v23 = vsub.f32 1.0, %v1141_v9 }
 0x31f   : > { %v1186_v24 = vmul.f32 %v1182_v11, %v1164_v15  ;;  %v1187_v25 = vmul.f32 %v1183_v19, %v1165_v16  ;;  %vm1152_vm12 = vcmp.eq.s32.totalorder %v1706_v0, %v1462_v8  ;;  %vm1153_vm13 = vcmp.eq.s32.totalorder %v1708_v20, %v1462_v8 }
 0x320   : > { %vm1158_vm14 = vcmp.eq.s32.totalorder %v1706_v0, %v1149_v22  ;;  %vm1159_vm15 = vcmp.eq.s32.totalorder %v1708_v20, %v1149_v22  ;;  %vm1170_vm0 = vcmp.eq.s32.totalorder %v1700_v50, %v1458_v10  ;;  %vm1176_vm1 = vcmp.eq.s32.totalorder %v1700_v50, %v1147_v21 }
 0x321   : > { %v1212_v26 = vmul.f32 %v1687_v30, %v1186_v24  ;;  %v1213_v27 = vmul.f32 %v1689_v33, %v1187_v25  ;;  %v1162_v28 = vsel %vm1158_vm14, %v1141_v9, 0.0  ;;  %v1163_v29 = vsel %vm1159_vm15, %v1141_v9, 0.0 }
 0x322   : > { %v1166_v31 = vsel %vm1152_vm12, %v1155_v23, %v1162_v28  ;;  %v1167_v32 = vsel %vm1153_vm13, %v1155_v23, %v1163_v29  ;;  %vm1177_vm3 = vcmp.eq.s32.totalorder %v1702_v56, %v1147_v21  ;;  %vm1171_vm4 = vcmp.eq.s32.totalorder %v1702_v56, %v1458_v10 }
 0x323   : > { %v1216_v35 = vadd.f32 %v1213_v27, %v1212_v26  ;;  %v1180_v0 = vsel %vm1176_vm1, %v1139_v5, 0.0  ;;  %v1181_v20 = vsel %vm1177_vm3, %v1139_v5, 0.0  ;;  %v1202_v46 = vmul.f32 %v1195_v40, %v1186_v24 }
 0x324   : > { %v1184_v36 = vsel %vm1170_vm0, %v1173_v12, %v1180_v0  ;;  %v1185_v38 = vsel %vm1171_vm4, %v1173_v12, %v1181_v20  ;;  %v1203_v47 = vmul.f32 %v1199_v42, %v1187_v25 }
 0x325   : > { %1217 = vadd.xlane.f32.xlu1 %v1216_v35  ;;  %v1188_v30 = vmul.f32 %v1184_v36, %v1166_v31  ;;  %v1189_v33 = vmul.f32 %v1185_v38, %v1167_v32 }
 0x326   : > { %v1206_v48 = vadd.f32 %v1203_v47, %v1202_v46 }
 0x327   : > { %v1214_v43 = vmul.f32 %v1693_v37, %v1188_v30  ;;  %v1215_v50 = vmul.f32 %v1695_v39, %v1189_v33  ;;  %v1204_v56 = vmul.f32 %v1195_v40, %v1188_v30  ;;  %v1205_v51 = vmul.f32 %v1199_v42, %v1189_v33  ;;  %v1228_v39 = vld [vmem:[%s310_s12] sm:$0xff] }
 0x329   : > { %v1219_v44 = vadd.f32 %v1215_v50, %v1214_v43  ;;  %v1209_v52 = vadd.f32 %v1205_v51, %v1204_v56 }
 0x32b   : > { %1220 = vadd.xlane.f32.xlu1 %v1219_v44 }
 0x32f   : > { %1207 = vadd.xlane.f32.xlu1 %v1206_v48 }
 0x333   : > { %1210 = vadd.xlane.f32.xlu1 %v1209_v52 }
 0x3b2   : > { %v1218_v53 = vpop.xlane.xlu1 %1217 }
 0x3b3   : > { %v1222_v55 = vmul.f32 0.03125, %v1218_v53 }
 0x3b5   : > { %v1224_v37 = vadd.f32 1.0, %v1222_v55 }
 0x3b7   : > { %v1226_v59 = vmul.f32 0.5, %v1224_v37 }
 0x3b8   : > { %v1221_v60 = vpop.xlane.xlu1 %1220 }
 0x3b9   : > { %v1223_v61 = vmul.f32 0.03125, %v1221_v60  ;;  %v1230_v62 = vmul.f32 %v1228_v39, %v1226_v59 }
 0x3bb   : > { %v1225_v49 = vadd.f32 1.0, %v1223_v61 }
 0x3bc   : > { %v1208_v57 = vpop.xlane.xlu1 %1207 }
 0x3bd   : > { %v1227_v63 = vmul.f32 0.5, %v1225_v49  ;;  %v1232_v41 = vmul.f32 %v1230_v62, %v1208_v57 }
 0x3bf   : > { %1234 = vst.msk [vmem:[%s334_s10] sm:$0xff] %vm1120_vm2, %v1232_v41  ;;  %v1231_v54 = vmul.f32 %v1229_v45, %v1227_v63 }
 0x3c0   : > { %v1211_v58 = vpop.xlane.xlu1 %1210 }
 0x3c1   : > { %v1233_v1 = vmul.f32 %v1231_v54, %v1211_v58 }
 0x3c3   : > { %1235 = vst.msk [vmem:[%s334_s10 + $0x8] sm:$0xff] %vm1120_vm2, %v1233_v1 }
 0x3c4 PF: > { %s28_s1 = sadd.s32 1, %s1524_s1  }
 0x3c5   : > { %p25_p4 = scmp.ge.s32.totalorder %s28_s1, 4  }
 0x3c7   :  { %27 = sbr.rel (!%p25_p4) target bundleno = 26 (0x1a), region = 87 }

</bundles_post_ra>
